<compile_context>
chip_gen: v5e
topology: v5e:2x2
jax: 0.10.0
libtpu: 0.0.40
codegen_flags: <defaults>
</compile_context>

<pallas_src>
import functools

import jax
import jax.numpy as jnp
from jax.experimental import pallas as pl
from jax.experimental.pallas import tpu as pltpu


def _round_up(v, m):
    return -(-v // m) * m


def _fused_gcn_kernel(x_ref, lap_ref, *refs, num_layers, fout_real):
    """All GCN layers for one (BB, Np, ...) batch block.

    refs = (w_0, b_0, ..., w_{L-1}, b_{L-1}, o_ref)
      x_ref: (BB, Np, F0_p)    lap_ref: (BB, Np, Np)
      w_i:   (Fi_p, Fi1_p)     b_i:     (1, Fi1_p)  (f32)
      o_ref: (BB, Np, FL_p)
    """
    o_ref = refs[2 * num_layers]
    cdt = x_ref.dtype
    x = x_ref[...]                  # (BB, Np, F0_p) compute dtype
    lap = lap_ref[...]              # (BB, Np, Np)   compute dtype
    bb, n_p, _ = x.shape

    for li in range(num_layers):
        w = refs[2 * li][...]       # (Fin_p, Fout_p)
        b = refs[2 * li + 1][...]   # (1, Fout_p) f32
        fin_p, fout_p = w.shape

        if fin_p < fout_p:
            # Aggregate first: (lap @ x) @ W  -- cheaper when Fin < Fout.
            agg = jnp.einsum("bnm,bmf->bnf", lap, x,
                             preferred_element_type=jnp.float32).astype(cdt)
            out = jnp.dot(agg.reshape(bb * n_p, fin_p), w,
                          preferred_element_type=jnp.float32)
            out = out.reshape(bb, n_p, fout_p)
        else:
            # Canonical: lap @ (x @ W).
            support = jnp.dot(x.reshape(bb * n_p, fin_p), w,
                              preferred_element_type=jnp.float32)
            support = support.reshape(bb, n_p, fout_p).astype(cdt)
            out = jnp.einsum("bnm,bmo->bno", lap, support,
                             preferred_element_type=jnp.float32)

        out = out + b               # f32 bias broadcast (1, Fout_p)

        if li + 1 < num_layers:
            # F.elu(alpha=1.0); padded lanes stay exactly 0 (elu(0)=0).
            x = jnp.where(out > 0, out, jnp.exp(out) - 1.0).astype(cdt)
        else:
            # log_softmax over the REAL output lanes only.
            if fout_real == fout_p:
                m = jnp.max(out, axis=-1, keepdims=True)
                s = out - m
                lse = jnp.log(jnp.sum(jnp.exp(s), axis=-1, keepdims=True))
            else:
                lane = jax.lax.broadcasted_iota(jnp.int32, out.shape, 2)
                valid = lane < fout_real
                m = jnp.max(jnp.where(valid, out, -jnp.inf),
                            axis=-1, keepdims=True)
                s = out - m
                lse = jnp.log(jnp.sum(jnp.where(valid, jnp.exp(s), 0.0),
                                      axis=-1, keepdims=True))
            o_ref[...] = (s - lse).astype(o_ref.dtype)


def fused_gcn(x, lap, weights, biases, *, compute_dtype=jnp.float32):
    """All GCN layers (matmuls + bias + ELU + final log_softmax) in one call."""
    orig_dtype = x.dtype
    B, N, F0 = x.shape
    num_layers = len(weights)
    fout_real = int(weights[-1].shape[1])

    dims = [int(F0)] + [int(w.shape[1]) for w in weights]
    dims_p = [_round_up(d, 128) for d in dims]        # lane-dense features
    Np = _round_up(N, 8)                              # sublane-aligned vertices
    itemsize = jnp.dtype(compute_dtype).itemsize

    # Batch block: amortize per-step overhead, feed the MXU >=256 rows, keep
    # double-buffered blocks + weights under a conservative 12 MiB (fits the
    # default scoped VMEM on v5e/v6e/v7x), and leave >=2 grid steps when B
    # allows so v7x's second TensorCore gets work.
    bb = max(1, 256 // Np)
    if B > 1:
        bb = min(bb, -(-B // 2))
    bb = min(bb, B)
    weight_bytes = sum(dims_p[i] * dims_p[i + 1] * itemsize + dims_p[i + 1] * 4
                       for i in range(num_layers))

    def _vmem_bytes(bb_):
        blk = bb_ * Np * (dims_p[0] + Np + dims_p[-1]) * itemsize
        return 2 * blk + 2 * weight_bytes

    while bb > 1 and _vmem_bytes(bb) > 12 * 1024 * 1024:
        bb = max(1, bb // 2)
    Bp = _round_up(B, bb)
    grid = Bp // bb

    # Zero-pad inputs / params (padded cols of W and b are zero, so padded
    # feature lanes stay exactly zero through every layer; padded rows/batches
    # are sliced away after the call).
    xp = jnp.zeros((Bp, Np, dims_p[0]), compute_dtype)
    xp = xp.at[:B, :N, :F0].set(x.astype(compute_dtype))
    lapp = jnp.zeros((Bp, Np, Np), compute_dtype)
    lapp = lapp.at[:B, :N, :N].set(lap.astype(compute_dtype))

    wb_inputs, wb_specs = [], []
    for i, (w, b) in enumerate(zip(weights, biases)):
        fin, fout = w.shape
        wp = jnp.zeros((dims_p[i], dims_p[i + 1]), compute_dtype)
        wp = wp.at[:fin, :fout].set(w.astype(compute_dtype))
        bp = jnp.zeros((1, dims_p[i + 1]), jnp.float32)
        bp = bp.at[:, :fout].set(b.astype(jnp.float32))
        wb_inputs += [wp, bp]
        wb_specs += [
            pl.BlockSpec((dims_p[i], dims_p[i + 1]), lambda g: (0, 0)),
            pl.BlockSpec((1, dims_p[i + 1]), lambda g: (0, 0)),
        ]

    # Advisory cost estimate for XLA scheduling around the custom call.
    flops, trans = 0, 0
    for i in range(num_layers):
        fin_p, fout_p = dims_p[i], dims_p[i + 1]
        flops += 2 * Bp * (Np * Np * min(fin_p, fout_p) + Np * fin_p * fout_p)
        trans += Bp * Np * fout_p
    bytes_accessed = (itemsize * (Bp * Np * dims_p[0] + Bp * Np * Np)
                      + weight_bytes + 4 * Bp * Np * dims_p[-1])

    kernel = functools.partial(_fused_gcn_kernel, num_layers=num_layers,
                               fout_real=fout_real)
    out = pl.pallas_call(
        kernel,
        out_shape=jax.ShapeDtypeStruct((Bp, Np, dims_p[-1]), orig_dtype),
        grid_spec=pltpu.PrefetchScalarGridSpec(
            num_scalar_prefetch=0,
            grid=(grid,),
            in_specs=[
                pl.BlockSpec((bb, Np, dims_p[0]), lambda g: (g, 0, 0)),
                pl.BlockSpec((bb, Np, Np), lambda g: (g, 0, 0)),
            ] + wb_specs,
            out_specs=pl.BlockSpec((bb, Np, dims_p[-1]), lambda g: (g, 0, 0)),
        ),
        compiler_params=pltpu.CompilerParams(
            dimension_semantics=("parallel",)),
        cost_estimate=pl.CostEstimate(flops=flops, transcendentals=trans,
                                      bytes_accessed=bytes_accessed),
    )(xp, lapp, *wb_inputs)
    return out[:B, :N, :fout_real]


def batch_gcn_forward(params, x, vertices, lap, *, compute_dtype=jnp.float32):
    """Pallas-backed BatchGCN forward (inference mode: dropout is identity).

    compute_dtype=jnp.bfloat16 is recommended on v6e/v7x for throughput
    (MXU inputs only; bias/ELU/log_softmax stay f32); default f32 matches the
    PyTorch module bit-for-bit up to accumulation order.
    """
    emb = params["embedding"][vertices]                    # (B, N, emb_dim)
    x = jnp.concatenate([x, emb], axis=2)
    if params["use_vertex_feature"]:
        vfeature = params["vertex_feature"][vertices]      # (B, N, vf_dim)
        x = jnp.concatenate([x, vfeature], axis=2)
    # TODO(synk): instance_normalization branch (InstanceNorm1d) not implemented
    #             (module default is False).
    return fused_gcn(x, lap, params["weights"], params["biases"],
                     compute_dtype=compute_dtype)


def batch_gcn_reference(params, x, vertices, lap):
    """Pure-JAX reference for numerical validation."""
    emb = params["embedding"][vertices]
    x = jnp.concatenate([x, emb], axis=2)
    if params["use_vertex_feature"]:
        x = jnp.concatenate([x, params["vertex_feature"][vertices]], axis=2)
    num_layers = len(params["weights"])
    for i in range(num_layers):
        support = jnp.einsum("bnf,fo->bno", x, params["weights"][i])
        x = jnp.einsum("bnm,bmo->bno", lap, support) + params["biases"][i]
        if i + 1 < num_layers:
            x = jnp.where(x > 0, x, jnp.exp(x) - 1.0)
    return jax.nn.log_softmax(x, axis=-1)


def init_params(key, *, vocab, emb_dim, vf_dim, n_units, use_vertex_feature):
    """Deterministic synthetic parameters (shapes match the module __init__)."""
    keys = jax.random.split(key, 3 + 2 * (len(n_units) - 1))
    pretrained_emb = jax.random.normal(keys[0], (vocab, emb_dim), jnp.float32)
    vertex_feature = jax.random.normal(keys[1], (vocab, vf_dim), jnp.float32)

    n_units = list(n_units)
    n_units[0] += emb_dim
    if use_vertex_feature:
        n_units[0] += vf_dim

    weights, biases = [], []
    for i in range(len(n_units) - 1):
        fin, fout = n_units[i], n_units[i + 1]
        stdv = 1.0 / jnp.sqrt(jnp.float32(fout))
        w = jax.random.uniform(keys[2 + 2 * i], (fin, fout), jnp.float32,
                               minval=-stdv, maxval=stdv)
        b = jax.random.uniform(keys[3 + 2 * i], (1, fout), jnp.float32,
                               minval=-stdv, maxval=stdv)
        weights.append(w)
        biases.append(b)

    return {
        "embedding": pretrained_emb,
        "vertex_feature": vertex_feature,
        "use_vertex_feature": use_vertex_feature,
        "weights": weights,
        "biases": biases,
    }


if __name__ == "__main__":
    key = jax.random.PRNGKey(0)
    k_param, k_x, k_v, k_lap = jax.random.split(key, 4)

    # Small shapes consistent with the module's forward.
    B, N = 2, 8            # batch of subgraphs, vertices per subgraph
    feat_dim = 4           # raw influence features per vertex (x input)
    emb_dim, vf_dim = 16, 8
    vocab = 32             # embedding table rows
    n_units = [feat_dim, 32, 8]   # n_units[0] gets +emb_dim(+vf_dim) inside init

    params = init_params(k_param, vocab=vocab, emb_dim=emb_dim, vf_dim=vf_dim,
                         n_units=n_units, use_vertex_feature=True)

    x = jax.random.normal(k_x, (B, N, feat_dim), jnp.float32)
    vertices = jax.random.randint(k_v, (B, N), 0, vocab)
    # Row-normalized random "laplacian"/adjacency.
    adj = jax.random.uniform(k_lap, (B, N, N), jnp.float32)
    lap = adj / jnp.sum(adj, axis=-1, keepdims=True)

    out = batch_gcn_forward(params, x, vertices, lap)
    out = jax.block_until_ready(out)

    ref = batch_gcn_reference(params, x, vertices, lap)
    ref = jax.block_until_ready(ref)

    assert out.shape == (B, N, n_units[-1]), out.shape
    err = jnp.max(jnp.abs(out - ref))
    assert jnp.allclose(out, ref, atol=1e-4, rtol=1e-4), f"max abs err {err}"

    print("KERNEL_OK")
</pallas_src>

<mosaic_0001>
module attributes {stable_mosaic.version = 11 : i64} {
  func.func @_fused_gcn_kernel(%arg0: i32, %arg1: memref<1x8x128xf32, #tpu.memory_space<vmem>>, %arg2: memref<1x8x8xf32, #tpu.memory_space<vmem>>, %arg3: memref<128x128xf32, #tpu.memory_space<vmem>>, %arg4: memref<1x128xf32, #tpu.memory_space<vmem>>, %arg5: memref<128x128xf32, #tpu.memory_space<vmem>>, %arg6: memref<1x128xf32, #tpu.memory_space<vmem>>, %arg7: memref<1x8x128xf32, #tpu.memory_space<vmem>>) attributes {dimension_semantics = [#tpu.dimension_semantics<parallel>], iteration_bounds = array<i64: 2>, scalar_prefetch = 0 : i64, scratch_operands = 0 : i64, tpu.core_type = #tpu.core_type<tc>, window_params = [{transform_indices = @transform_0, window_bounds = array<i64: 1, 8, 128>}, {transform_indices = @transform_1, window_bounds = array<i64: 1, 8, 8>}, {pipeline_mode = #tpu.pipeline_mode<synchronous>, transform_indices = @transform_2, window_bounds = array<i64: 128, 128>}, {pipeline_mode = #tpu.pipeline_mode<synchronous>, transform_indices = @transform_3, window_bounds = array<i64: 1, 128>}, {pipeline_mode = #tpu.pipeline_mode<synchronous>, transform_indices = @transform_4, window_bounds = array<i64: 128, 128>}, {pipeline_mode = #tpu.pipeline_mode<synchronous>, transform_indices = @transform_5, window_bounds = array<i64: 1, 128>}, {transform_indices = @transform_6, window_bounds = array<i64: 1, 8, 128>}]} {
    %c0 = arith.constant 0 : index
    %c0_0 = arith.constant 0 : index
    %c0_1 = arith.constant 0 : index
    %0 = vector.load %arg1[%c0, %c0_0, %c0_1] : memref<1x8x128xf32, #tpu.memory_space<vmem>>, vector<1x8x128xf32>
    %c0_2 = arith.constant 0 : index
    %c0_3 = arith.constant 0 : index
    %c0_4 = arith.constant 0 : index
    %1 = vector.load %arg2[%c0_2, %c0_3, %c0_4] : memref<1x8x8xf32, #tpu.memory_space<vmem>>, vector<1x8x8xf32>
    %c0_5 = arith.constant 0 : index
    %c0_6 = arith.constant 0 : index
    %2 = vector.load %arg3[%c0_5, %c0_6] : memref<128x128xf32, #tpu.memory_space<vmem>>, vector<128x128xf32>
    %c0_7 = arith.constant 0 : index
    %c0_8 = arith.constant 0 : index
    %3 = vector.load %arg4[%c0_7, %c0_8] : memref<1x128xf32, #tpu.memory_space<vmem>>, vector<1x128xf32>
    %4 = vector.shape_cast %0 : vector<1x8x128xf32> to vector<8x128xf32>
    %cst = arith.constant dense<0.000000e+00> : vector<8x128xf32>
    %5 = tpu.matmul %4, %2, %cst {dimension_numbers = #tpu.dot_dimension_numbers<[1], [0], [0], [1], [0, 0, 1, 1], [], []>} : vector<8x128xf32>, vector<128x128xf32>, vector<8x128xf32> -> vector<8x128xf32>
    %6 = vector.shape_cast %5 : vector<8x128xf32> to vector<1x8x128xf32>
    "tpu.trace_start"() <{level = 10 : i32, message = "bnm,bmo->bno"}> : () -> ()
    %cst_9 = arith.constant dense<0.000000e+00> : vector<1x8x128xf32>
    %7 = tpu.matmul %1, %6, %cst_9 {dimension_numbers = #tpu.dot_dimension_numbers<[2], [1], [1], [2], [0, 0, 0, 1, 1, 2], [0], [0]>} : vector<1x8x8xf32>, vector<1x8x128xf32>, vector<1x8x128xf32> -> vector<1x8x128xf32>
    "tpu.trace_stop"() : () -> ()
    %8 = vector.shape_cast %3 : vector<1x128xf32> to vector<1x1x128xf32>
    %9 = vector.broadcast %8 : vector<1x1x128xf32> to vector<1x8x128xf32>
    %10 = arith.addf %7, %9 : vector<1x8x128xf32>
    %cst_10 = arith.constant 0.000000e+00 : f32
    %11 = vector.broadcast %cst_10 : f32 to vector<1x8x128xf32>
    %12 = arith.cmpf ogt, %10, %11 : vector<1x8x128xf32>
    %13 = math.exp %10 : vector<1x8x128xf32>
    %cst_11 = arith.constant 1.000000e+00 : f32
    %14 = vector.broadcast %cst_11 : f32 to vector<1x8x128xf32>
    %15 = arith.subf %13, %14 : vector<1x8x128xf32>
    %16 = arith.select %12, %10, %15 : vector<1x8x128xi1>, vector<1x8x128xf32>
    %c0_12 = arith.constant 0 : index
    %c0_13 = arith.constant 0 : index
    %17 = vector.load %arg5[%c0_12, %c0_13] : memref<128x128xf32, #tpu.memory_space<vmem>>, vector<128x128xf32>
    %c0_14 = arith.constant 0 : index
    %c0_15 = arith.constant 0 : index
    %18 = vector.load %arg6[%c0_14, %c0_15] : memref<1x128xf32, #tpu.memory_space<vmem>>, vector<1x128xf32>
    %19 = vector.shape_cast %16 : vector<1x8x128xf32> to vector<8x128xf32>
    %cst_16 = arith.constant dense<0.000000e+00> : vector<8x128xf32>
    %20 = tpu.matmul %19, %17, %cst_16 {dimension_numbers = #tpu.dot_dimension_numbers<[1], [0], [0], [1], [0, 0, 1, 1], [], []>} : vector<8x128xf32>, vector<128x128xf32>, vector<8x128xf32> -> vector<8x128xf32>
    %21 = vector.shape_cast %20 : vector<8x128xf32> to vector<1x8x128xf32>
    "tpu.trace_start"() <{level = 10 : i32, message = "bnm,bmo->bno"}> : () -> ()
    %cst_17 = arith.constant dense<0.000000e+00> : vector<1x8x128xf32>
    %22 = tpu.matmul %1, %21, %cst_17 {dimension_numbers = #tpu.dot_dimension_numbers<[2], [1], [1], [2], [0, 0, 0, 1, 1, 2], [0], [0]>} : vector<1x8x8xf32>, vector<1x8x128xf32>, vector<1x8x128xf32> -> vector<1x8x128xf32>
    "tpu.trace_stop"() : () -> ()
    %23 = vector.shape_cast %18 : vector<1x128xf32> to vector<1x1x128xf32>
    %24 = vector.broadcast %23 : vector<1x1x128xf32> to vector<1x8x128xf32>
    %25 = arith.addf %22, %24 : vector<1x8x128xf32>
    %26 = tpu.iota {dimensions = array<i32: 2>} : vector<1x8x128xi32>
    %c8_i32 = arith.constant 8 : i32
    %27 = vector.broadcast %c8_i32 : i32 to vector<1x8x128xi32>
    %28 = arith.cmpi slt, %26, %27 : vector<1x8x128xi32>
    %cst_18 = arith.constant 0xFF800000 : f32
    %29 = vector.broadcast %cst_18 : f32 to vector<1x8x128xf32>
    %30 = arith.select %28, %25, %29 : vector<1x8x128xi1>, vector<1x8x128xf32>
    %cst_19 = arith.constant dense<0xFF800000> : vector<1x8xf32>
    %31 = vector.multi_reduction <maximumf>, %30, %cst_19 [2] : vector<1x8x128xf32> to vector<1x8xf32>
    %32 = vector.shape_cast %31 : vector<1x8xf32> to vector<1x8x1xf32>
    %33 = vector.broadcast %32 : vector<1x8x1xf32> to vector<1x8x128xf32>
    %34 = arith.subf %25, %33 : vector<1x8x128xf32>
    %35 = math.exp %34 : vector<1x8x128xf32>
    %cst_20 = arith.constant 0.000000e+00 : f32
    %36 = vector.broadcast %cst_20 : f32 to vector<1x8x128xf32>
    %37 = arith.select %28, %35, %36 : vector<1x8x128xi1>, vector<1x8x128xf32>
    %cst_21 = arith.constant dense<0.000000e+00> : vector<1x8xf32>
    %38 = vector.multi_reduction <add>, %37, %cst_21 [2] : vector<1x8x128xf32> to vector<1x8xf32>
    %39 = vector.shape_cast %38 : vector<1x8xf32> to vector<1x8x1xf32>
    %40 = math.log %39 : vector<1x8x1xf32>
    %41 = vector.broadcast %40 : vector<1x8x1xf32> to vector<1x8x128xf32>
    %42 = arith.subf %34, %41 : vector<1x8x128xf32>
    %c0_22 = arith.constant 0 : index
    %c0_23 = arith.constant 0 : index
    %c0_24 = arith.constant 0 : index
    %43 = vector.load %arg7[%c0_22, %c0_23, %c0_24] : memref<1x8x128xf32, #tpu.memory_space<vmem>>, vector<1x8x128xf32>
    tpu.vector_store %arg7[%c0_22, %c0_23, %c0_24], %42 {strides = array<i32>} : memref<1x8x128xf32, #tpu.memory_space<vmem>>, vector<1x8x128xf32>,
    return
  }
  func.func @transform_0(%arg0: i32) -> (i32, i32, i32) {
    %c0_i32 = arith.constant 0 : i32
    %c0_i32_0 = arith.constant 0 : i32
    %c0_i32_1 = arith.constant 0 : i32
    return %arg0, %c0_i32, %c0_i32_0 : i32, i32, i32
  }
  func.func @transform_1(%arg0: i32) -> (i32, i32, i32) {
    %c0_i32 = arith.constant 0 : i32
    %c0_i32_0 = arith.constant 0 : i32
    %c0_i32_1 = arith.constant 0 : i32
    return %arg0, %c0_i32, %c0_i32_0 : i32, i32, i32
  }
  func.func @transform_2(%arg0: i32) -> (i32, i32) {
    %c0_i32 = arith.constant 0 : i32
    %c0_i32_0 = arith.constant 0 : i32
    %c0_i32_1 = arith.constant 0 : i32
    return %c0_i32, %c0_i32_0 : i32, i32
  }
  func.func @transform_3(%arg0: i32) -> (i32, i32) {
    %c0_i32 = arith.constant 0 : i32
    %c0_i32_0 = arith.constant 0 : i32
    %c0_i32_1 = arith.constant 0 : i32
    return %c0_i32, %c0_i32_0 : i32, i32
  }
  func.func @transform_4(%arg0: i32) -> (i32, i32) {
    %c0_i32 = arith.constant 0 : i32
    %c0_i32_0 = arith.constant 0 : i32
    %c0_i32_1 = arith.constant 0 : i32
    return %c0_i32, %c0_i32_0 : i32, i32
  }
  func.func @transform_5(%arg0: i32) -> (i32, i32) {
    %c0_i32 = arith.constant 0 : i32
    %c0_i32_0 = arith.constant 0 : i32
    %c0_i32_1 = arith.constant 0 : i32
    return %c0_i32, %c0_i32_0 : i32, i32
  }
  func.func @transform_6(%arg0: i32) -> (i32, i32, i32) {
    %c0_i32 = arith.constant 0 : i32
    %c0_i32_0 = arith.constant 0 : i32
    %c0_i32_1 = arith.constant 0 : i32
    return %arg0, %c0_i32, %c0_i32_0 : i32, i32, i32
  }
}

</mosaic_0001>

<bundles_post_ra>
// kernel: tpu_custom_call.1
= control target key start
LH: loop header
LB: loop body
LE: loop exit
PB: predicated region body
PF: predicated region fallthrough
CT: control target
= control target key end

     0   :  { %s1152_s0 = inlined_call_operand.hbm [shape: f32[2,8,128], index: 0, kind: input, shape index: {}]   ;;  %s1153_s1 = inlined_call_operand.hbm [shape: f32[2,8,8], index: 1, kind: input, shape index: {}]   ;;  %s1154_s2 = inlined_call_operand.hbm [shape: f32[128,128], index: 2, kind: input, shape index: {}]   ;;  %s1155_s3 = inlined_call_operand.vmem [shape: f32[1,128], index: 3, kind: input, shape index: {}]   ;;  %s1156_s4 = inlined_call_operand.hbm [shape: f32[128,128], index: 4, kind: input, shape index: {}]   ;;  %s1157_s5 = inlined_call_operand.vmem [shape: f32[1,128], index: 5, kind: input, shape index: {}]   ;;  %s1158_s6 = inlined_call_operand.hbm [shape: f32[2,8,128], index: 6, kind: output, shape index: {}]  }
   0x1   :  { %1162 = sst [smem:[#allocation19_spill]] %s1154_s2 }
   0x2   :  { %1163 = sst [smem:[#allocation20_spill]] %s1156_s4 }
   0x3   :  { %11 = vsyncpa [#allocation3], 0 }
   0x4   :  { %13 = vsyncpa [#allocation3 + $0x1], 0 }
   0x5   :  { %14 = vsyncpa [#allocation6], 0 }
   0x6   :  { %16 = vsyncpa [#allocation6 + $0x1], 0 }
   0x7   :  { %17 = vsyncpa [#allocation9], 0 }
   0x8   :  { %18 = vsyncpa [#allocation4], 0 }
   0x9   :  { %20 = vsyncpa [#allocation4 + $0x1], 0  ;;  %s959_s21 = smov 0   ;;  %s961_s22 = smov 0  }
   0xa   :  { %s963_s23 = smov 0   ;;  %s965_s24 = smov 0  }
   0xb LB: > { %1164 = sst [smem:[#allocation16_spill]] %s914_s23  ;;  %s983_s28 = sadd.s32 4294967295, %s918_s24   ;;  %s918_s24 = sphi %s965_s24, %s1176_s24   ;;  %s914_s23 = sphi %s963_s23, %s1178_s23   ;;  %s910_s22 = sphi %s961_s22, %s1180_s22   ;;  %s906_s21 = sphi %s959_s21, %s1179_s21  }
   0xc   : > { %s1165_s2 = sld [smem:[#allocation19_spill]]  ;;  %p617_p0 = scmp.ge.s32.totalorder %s918_s24, 1 }
   0xd   : > { %p47_p1 = scmp.eq.s32.totalorder %s983_s28, 0  ;;  %p193_p2 = scmp.lt.s32.totalorder %s918_s24, 3 }
   0xe   : > { %s920_s30 = smov [#allocation7]   ;;  %s1167_s4 = sld [smem:[#allocation20_spill]] }
   0xf   : > { %p988_p3 = pnand %p617_p0, %p193_p2  ;;  %s206_s7 = sshll.u32 %s920_s30, 4  ;;  %s207_s7 = int_to_ptr.vmem [resolvable:$true] %s206_s7 }
  0x10   : > { %s921_s11 = smov [#allocation8]   ;;  %s922_s13 = smov 128  }
  0x11   : > { %p652_p4 = pneg %p988_p3  ;;  %s223_s12 = sshll.u32 %s921_s11, 4  ;;  %s224_s12 = int_to_ptr.vmem [resolvable:$true] %s223_s12 }
  0x12   : > { %s204_s27 = sshll.u32 %s1165_s2, 4  ;;  %s923_s14 = smov 8   ;;  %s205_s27 = int_to_ptr.hbm [resolvable:$true] %s204_s27 }
  0x13   : > { %p653_p6 = pnand %p652_p4, %p47_p1  ;;  %s616_s15 = sadd.s32 4294967294, %s918_s24  }
  0x14   : > { %s221_s10 = sshll.u32 %s1167_s4, 4  ;;  %s1002_s16 = sadd.s32 1, %s918_s24   ;;  %s222_s10 = int_to_ptr.hbm [resolvable:$true] %s221_s10 }
  0x15   : > { %655 = dma.hbm_to_vmem [thread:$0]  (!%p653_p6), %s205_s27, 2048, %s207_s7, [#allocation6], %s922_s13, %s922_s13, %s923_s14  }
  0x16   : > { %658 = dma.hbm_to_vmem [thread:$0]  (!%p653_p6), %s222_s10, 2048, %s224_s12, [#allocation9], %s922_s13, %s922_s13, %s923_s14  }
  0x17   : > { %1168 = sst [smem:[#allocation17_spill]] %s1002_s16  ;;  %s30_s17 = ssub.s32 %s918_s24, %s1002_s16 }
  0x18   : > { %s33_s18 = sadd.s32 1, %s914_s23  ;;  %p31_p7 = scmp.eq.s32.totalorder %s30_s17, 0 }
  0x19   : > { %p40_p8 = scmp.ne.s32.totalorder %s914_s23, %s910_s22  ;;  %p41_p9 = scmp.eq.s32.totalorder %s918_s24, 0 }
  0x1a   : > { %p46_p10 = scmp.ne.s32.totalorder %s910_s22, %s906_s21  ;;  %p180_p13 = scmp.eq.s32.totalorder %s983_s28, 1 }
  0x1b   : > { %s1013_s19 = scalar_select %p31_p7, %s914_s23, %s33_s18  }
  0x1c   : > { %p1015_p11 = por %p41_p9, %p40_p8  ;;  %p1021_p12 = por %p47_p1, %p46_p10 }
  0x1d   : > { %1169 = sst [smem:[#allocation18_spill]] %s1013_s19  ;;  %p186_p0 = scmp.eq.s32.totalorder %s616_s15, 1 }
  0x1e   : > { %p672_p2 = scmp.lt.s32.totalorder %s918_s24, 2  ;;  %s240_s26 = sand.u32 1, %s914_s23  }
  0x1f   : > { %p1028_p4 = por %p180_p13, %p40_p8  ;;  %p1032_p6 = por %p186_p0, %p46_p10 }
  0x20   : > { %s1036_s7 = sshll.u32 %s240_s26, 3  ;;  %s622_s8 = sshll.u32 %s918_s24, 3 }
  0x21   : > { %s248_s11 = scalar_lea.hbm %s1152_s0, %s622_s8  ;;  %s244_s12 = scalar_lea.vmem [#allocation2], %s1036_s7 }
  0x22   : > { %s252_s13 = sshll.u32 %s244_s12, 4  ;;  %s250_s14 = sshll.u32 %s248_s11, 4  ;;  %s253_s13 = int_to_ptr.vmem [resolvable:$true] %s252_s13  ;;  %s251_s14 = int_to_ptr.hbm [resolvable:$true] %s250_s14 }
  0x23   : > { %p1045_p7 = pnand %p672_p2, %p1015_p11  ;;  %s267_s2 = scalar_lea.hbm %s1153_s1, %s622_s8 }
  0x24   : > { %s259_s4 = sand.u32 1, %s918_s24   ;;  %s241_s19 = scalar_lea.sflag [#allocation3], %s240_s26 }
  0x25   : > { %s780_s9 = sshra.s32 %s251_s14, 4  ;;  %p784_p9 = pneg %p1045_p7  ;;  %s781_s9 = int_to_ptr.hbm [resolvable:$true] %s780_s9 }
  0x26   : > { %s782_s10 = scalar_lea.hbm %s781_s9, 8  ;;  %s787_s12 = scalar_lea.hbm %s1152_s0, 16 }
  0x27   : > { %p783_p8 = scmp.ne.s32.totalorder %s781_s9, %s782_s10  ;;  %p788_p13 = scmp.lt.s32.totalorder %s781_s9, %s1152_s0 }
  0x28   : > { %p789_p0 = scmp.lt.s32.totalorder %s787_s12, %s782_s10 }
  0x29   : > { %p785_p10 = pnand %p784_p9, %p783_p8 }
  0x2a   : > { %p790_p2 = por %p789_p0, %p788_p13 }
  0x2b   : > { %p786_p11 = pneg %p785_p10 }
  0x2d   : > { %p791_p5 = pnand %p790_p2, %p786_p11 }
  0x2f   : > { %794 = shalt.err (!%p791_p5)
}
  0x30   : > { %662 = dma.hbm_to_vmem [thread:$0]  (!%p1045_p7), %s251_s14, 128, %s253_s13, %s241_s19  }
  0x31   : > { %s269_s26 = sshll.u32 %s267_s2, 4  ;;  %s263_s8 = scalar_lea.vmem [#allocation5], %s1036_s7  ;;  %s270_s26 = int_to_ptr.hbm [resolvable:$true] %s269_s26 }
  0x32   : > { %s271_s23 = sshll.u32 %s263_s8, 4  ;;  %s260_s20 = scalar_lea.sflag [#allocation6], %s259_s4  ;;  %s272_s23 = int_to_ptr.vmem [resolvable:$true] %s271_s23 }
  0x33   : > { %s810_s11 = sshra.s32 %s270_s26, 4  ;;  %s817_s12 = scalar_lea.hbm %s1153_s1, 16  ;;  %s811_s11 = int_to_ptr.hbm [resolvable:$true] %s810_s11 }
  0x34   : > { %s812_s16 = scalar_lea.hbm %s811_s11, 8  ;;  %p818_p5 = scmp.lt.s32.totalorder %s811_s11, %s1153_s1 }
  0x35   : > { %p813_p8 = scmp.ne.s32.totalorder %s811_s11, %s812_s16  ;;  %p819_p13 = scmp.lt.s32.totalorder %s817_s12, %s812_s16 }
  0x37   : > { %p815_p10 = pnand %p813_p8, %p784_p9  ;;  %p820_p0 = por %p819_p13, %p818_p5 }
  0x39   : > { %p816_p11 = pneg %p815_p10 }
  0x3b   : > { %p821_p2 = pnand %p820_p0, %p816_p11 }
  0x3d   : > { %824 = shalt.err (!%p821_p2)
}
  0x3e   : > { %665 = dma.hbm_to_vmem [thread:$0]  (!%p1045_p7), %s270_s26, 128, %s272_s23, %s260_s20  }
  0x3f   : > { %280 = sbr.rel (%p988_p3) target bundleno = 901 (0x385), region = 44  ;;  %s1081_s2 = sand.u32 (!%p988_p3), 1, %s910_s22  }
  0x40   : > { %s1084_s4 = sshll.u32 (!%p988_p3), %s1081_s2, 3  ;;  %s283_s7 = scalar_lea.sflag (!%p988_p3), [#allocation3], %s1081_s2 }
  0x41   : > { %s286_s16 = scalar_lea.vmem (!%p988_p3), [#allocation2], %s1084_s4 }
  0x44   : > { %885 = dma.done.wait (%p1021_p12), %s283_s7, 128  }
  0x45   : > { %887 = vsyncadd (%p1021_p12), %s283_s7, 4294967168  ;;  %s292_s23 = sand.u32 1, %s983_s28   ;;  %s296_s13 = scalar_lea.vmem [#allocation5], %s1084_s4 }
  0x46   : > { %s293_s29 = scalar_lea.sflag [#allocation6], %s292_s23 }
  0x47   : > { %889 = dma.done.wait (%p1021_p12), %s293_s29, 128  }
  0x48   : > { %891 = vsyncadd (%p1021_p12), %s293_s29, 4294967168 }
  0x49   : > { %893 = dma.done.wait (%p47_p1), [#allocation6], 2048  }
  0x4a   : > { %895 = vsyncadd (%p47_p1), [#allocation6], 4294965248 }
  0x4b   : > { %897 = dma.done.wait (%p47_p1), [#allocation9], 2048  }
  0x4c   : > { %899 = vsyncadd (%p47_p1), [#allocation9], 4294965248  ;;  %v358_v0 = vld [vmem:[#allocation7 + $0x78] sm:$0xff]  ;;  %v357_v1 = vld [vmem:[#allocation7 + $0x70] sm:$0xff]  ;;  %vm383_vm0 = vcmask 64512   ;;  %v472_v43 = vlaneseq  ;;  %s635_s26 = sshll.u32 %s983_s28, 3 }
  0x4d   : > { %360 = vmatpush.msra.mxu0 %v358_v0  ;;  %v356_v2 = vld [vmem:[#allocation7 + $0x68] sm:$0xff]  ;;  %v355_v3 = vld [vmem:[#allocation7 + $0x60] sm:$0xff]  ;;  %v354_v4 = vld [vmem:[#allocation7 + $0x58] sm:$0xff]  ;;  %s499_s11 = scalar_lea.hbm %s1158_s6, %s635_s26  ;;  %s340_s9 = scalar_lea.vmem [#allocation10], %s1084_s4 }
  0x4e   : > { %v353_v5 = vld [vmem:[#allocation7 + $0x50] sm:$0xff]  ;;  %v352_v6 = vld [vmem:[#allocation7 + $0x48] sm:$0xff]  ;;  %v351_v7 = vld [vmem:[#allocation7 + $0x40] sm:$0xff]  ;;  %v473_v44 = vand.u32 127, %v472_v43  ;;  %s501_s10 = sshll.u32 %s340_s9, 4  ;;  %s503_s12 = sshll.u32 %s499_s11, 4  ;;  %s502_s10 = int_to_ptr.vmem [resolvable:$true] %s501_s10  ;;  %s504_s12 = int_to_ptr.hbm [resolvable:$true] %s503_s12 }
  0x4f   : > { %361 = vmatpush.msra.mxu0 %v357_v1  ;;  %v350_v8 = vld [vmem:[#allocation7 + $0x38] sm:$0xff]  ;;  %v349_v9 = vld [vmem:[#allocation7 + $0x30] sm:$0xff]  ;;  %v348_v10 = vld [vmem:[#allocation7 + $0x28] sm:$0xff]  ;;  %s489_s17 = scalar_lea.sflag [#allocation4], %s1081_s2  ;;  %s854_s19 = sshra.s32 %s504_s12, 4  ;;  %s855_s19 = int_to_ptr.hbm [resolvable:$true] %s854_s19 }
  0x50   : > { %v347_v11 = vld [vmem:[#allocation7 + $0x20] sm:$0xff]  ;;  %v346_v12 = vld [vmem:[#allocation7 + $0x18] sm:$0xff]  ;;  %v345_v13 = vld [vmem:[#allocation7 + $0x10] sm:$0xff]  ;;  %vm474_vm2 = vcmp.lt.s32.totalorder %v473_v44, 8  ;;  %s856_s7 = scalar_lea.hbm %s855_s19, 8  ;;  %s860_s23 = scalar_lea.hbm %s1158_s6, 16 }
  0x51   : > { %362 = vmatpush.msra.mxu0 %v356_v2  ;;  %v344_v14 = vld [vmem:[#allocation7 + $0x8] sm:$0xff]  ;;  %v343_v15 = vld [vmem:[#allocation7] sm:$0xff]  ;;  %v427_v17 = vld [vmem:[#allocation8 + $0x78] sm:$0xff]  ;;  %p857_p1 = scmp.ne.s32.totalorder %s855_s19, %s856_s7  ;;  %p861_p7 = scmp.lt.s32.totalorder %s855_s19, %s1158_s6 }
  0x52   : > { %v341_v16 = vld [vmem:[%s286_s16] sm:$0xff]  ;;  %v426_v18 = vld [vmem:[#allocation8 + $0x70] sm:$0xff]  ;;  %429 = vmatpush.msra.mxu2 %v427_v17  ;;  %v423_v21 = vld [vmem:[#allocation8 + $0x58] sm:$0xff]  ;;  %p862_p9 = scmp.lt.s32.totalorder %s860_s23, %s856_s7 }
  0x53   : > { %363 = vmatpush.msra.mxu0 %v355_v3  ;;  %v425_v19 = vld [vmem:[#allocation8 + $0x68] sm:$0xff]  ;;  %v424_v20 = vld [vmem:[#allocation8 + $0x60] sm:$0xff]  ;;  %v422_v22 = vld [vmem:[#allocation8 + $0x50] sm:$0xff]  ;;  %p858_p3 = pnand %p857_p1, %p1028_p4 }
  0x54   : > { %430 = vmatpush.msra.mxu2 %v426_v18  ;;  %v421_v23 = vld [vmem:[#allocation8 + $0x48] sm:$0xff]  ;;  %v420_v24 = vld [vmem:[#allocation8 + $0x40] sm:$0xff]  ;;  %v342_v25 = vld [vmem:[%s296_s13] sm:$0xff]  ;;  %p863_p8 = por %p862_p9, %p861_p7 }
  0x55   : > { %364 = vmatpush.msra.mxu0 %v354_v4  ;;  %v419_v27 = vld [vmem:[#allocation8 + $0x38] sm:$0xff]  ;;  %v418_v28 = vld [vmem:[#allocation8 + $0x30] sm:$0xff]  ;;  %v417_v29 = vld [vmem:[#allocation8 + $0x28] sm:$0xff]  ;;  %p859_p12 = pneg %p858_p3 }
  0x56   : > { %431 = vmatpush.msra.mxu2 %v425_v19  ;;  %v416_v30 = vld [vmem:[#allocation8 + $0x20] sm:$0xff]  ;;  %v415_v31 = vld [vmem:[#allocation8 + $0x18] sm:$0xff]  ;;  %v414_v32 = vld [vmem:[#allocation8 + $0x10] sm:$0xff] }
  0x57   : > { %365 = vmatpush.msra.mxu0 %v353_v5  ;;  %v413_v33 = vld [vmem:[#allocation8 + $0x8] sm:$0xff]  ;;  %v412_v34 = vld [vmem:[#allocation8] sm:$0xff]  ;;  %p864_p10 = pnand %p863_p8, %p859_p12 }
  0x58   : > { %432 = vmatpush.msra.mxu2 %v424_v20  ;;  %v712_v35 = vld [vmem:[%s1155_s3] ss:$0 sm:$0xff] }
  0x59   : > { %366 = vmatpush.msra.mxu0 %v352_v6  ;;  %v713_v45 = vld [vmem:[%s1157_s5] ss:$0 sm:$0xff] }
  0x5a   : > { %433 = vmatpush.msra.mxu2 %v423_v21 }
  0x5b   : > { %367 = vmatpush.msra.mxu0 %v351_v7 }
  0x5c   : > { %434 = vmatpush.msra.mxu2 %v422_v22 }
  0x5d   : > { %368 = vmatpush.msra.mxu0 %v350_v8 }
  0x5e   : > { %435 = vmatpush.msra.mxu2 %v421_v23 }
  0x5f   : > { %369 = vmatpush.msra.mxu0 %v349_v9 }
  0x60   : > { %436 = vmatpush.msra.mxu2 %v420_v24 }
  0x61   : > { %370 = vmatpush.msra.mxu0 %v348_v10 }
  0x62   : > { %437 = vmatpush.msra.mxu2 %v419_v27 }
  0x63   : > { %371 = vmatpush.msra.mxu0 %v347_v11 }
  0x64   : > { %438 = vmatpush.msra.mxu2 %v418_v28 }
  0x65   : > { %372 = vmatpush.msra.mxu0 %v346_v12 }
  0x66   : > { %439 = vmatpush.msra.mxu2 %v417_v29 }
  0x67   : > { %373 = vmatpush.msra.mxu0 %v345_v13 }
  0x68   : > { %440 = vmatpush.msra.mxu2 %v416_v30 }
  0x69   : > { %374 = vmatpush.msra.mxu0 %v344_v14 }
  0x6a   : > { %441 = vmatpush.msra.mxu2 %v415_v31 }
  0x6b   : > { %375 = vmatpush.msra.mxu0 %v343_v15 }
  0x6c   : > { %376 = vmatmul.f32.vlgmr.msra.gmra.mxu0 %v341_v16  ;;  %442 = vmatpush.msra.mxu2 %v414_v32 }
  0x6e   : > { %443 = vmatpush.msra.mxu2 %v413_v33 }
  0x70   : > { %444 = vmatpush.msra.mxu2 %v412_v34 }
  0xe9   : > { %v377_v26 = vpop.f32.mrf.mxu0 }
  0xea   : > { %402 = vmatpush.msra.mxu1 %v377_v26 }
  0xeb   : > { %631 = vmatmul.msk.f32.vlgmr.msra.gmra.mxu1 %vm383_vm0, %v342_v25 }
 0x168   : > { %v404_v36 = vpop.f32.mrf.mxu1 }
 0x169   : > { %v405_v37 = vadd.f32 %v712_v35, %v404_v36 }
 0x16b   : > { %v408_v38 = vmul.f32 1.442695, %v405_v37  ;;  %vm407_vm1 = vcmp.gt.f32.partialorder %v405_v37, 0.0 }
 0x16d   : > { %714 = vpow2.f32 %v408_v38 }
 0x173   : > { %v715_v39 = vpop.eup %714 }
 0x174   : > { %v632_v40 = vadd.f32 -1.0, %v715_v39 }
 0x176   : > { %v411_v41 = vsel %vm407_vm1, %v405_v37, %v632_v40 }
 0x177   : > { %445 = vmatmul.f32.vlgmr.msra.gmra.mxu2 %v411_v41 }
 0x1fa   : > { %v446_v42 = vpop.f32.mrf.mxu2 }
 0x1fb   : > { %467 = vmatpush.msra.mxu3 %v446_v42 }
 0x1fc   : > { %633 = vmatmul.msk.f32.vlgmr.msra.gmra.mxu3 %vm383_vm0, %v342_v25 }
 0x27f   : > { %v469_v46 = vpop.f32.mrf.mxu3 }
 0x280   : > { %v470_v47 = vadd.f32 %v713_v45, %v469_v46 }
 0x282   : > { %v475_v48 = vsel %vm474_vm2, %v470_v47, -inf }
 0x283   : > { %476 = vmax.xlane.f32.xlu0 %v475_v48 }
 0x2f6   : > { %v477_v49 = vpop.xlane.xlu0 %476 }
 0x2f7   : > { %v478_v50 = vsub.f32 %v470_v47, %v477_v49 }
 0x2f9   : > { %v479_v51 = vmul.f32 1.442695, %v478_v50 }
 0x2fb   : > { %716 = vpow2.f32 %v479_v51 }
 0x301   : > { %v717_v52 = vpop.eup %716 }
 0x302   : > { %v481_v53 = vsel %vm474_vm2, %v717_v52, 0.0 }
 0x303   : > { %482 = vadd.xlane.f32.xlu0 %v481_v53 }
 0x376   : > { %v483_v54 = vpop.xlane.xlu0 %482 }
 0x377   : > { %718 = vlog2.f32 %v483_v54 }
 0x37d   : > { %v719_v55 = vpop.eup %718 }
 0x37e   : > { %v485_v56 = vmul.f32 0.6931472, %v719_v55 }
 0x380   : > { %v486_v57 = vsub.f32 %v478_v50, %v485_v56 }
 0x382   : > { %487 = vst [vmem:[%s340_s9] sm:$0xff] %v486_v57 }
 0x383   : > { %867 = shalt.err (!%p864_p10)
}
 0x384   : > { %650 = dma.vmem_to_hbm [thread:$0]  (%p1028_p4), %s502_s10, 128, %s504_s12, %s489_s17  }
 0x385 PF: > { %s515_s2 = sand.u32 1, %s906_s21   ;;  %p1175_p11 = scmp.ge.s32.totalorder %s918_s24, 2 }
 0x386   : > { %s516_s13 = scalar_lea.sflag [#allocation4], %s515_s2 }
 0x387   : > { %p667_p5 = pnand %p1175_p11, %p1032_p6 }
 0x389   : > { %p668_p13 = pneg %p667_p5 }
 0x38b   : > { %901 = dma.done.wait (%p668_p13), %s516_s13, 128  }
 0x38c   : > { %903 = vsyncadd (%p668_p13), %s516_s13, 4294967168  ;;  %s1176_s24 = sld [smem:[#allocation17_spill]]  ;;  %s1179_s21 = smov %s910_s22 }
 0x38d   : > { %s1177_s25 = sld [smem:[#allocation16_spill]] }
 0x38e   : > { %s1178_s23 = sld [smem:[#allocation18_spill]] }
 0x392   : > { %p23_p0 = scmp.ge.s32.totalorder %s1176_s24, 4  }
 0x393   : > { %s1180_s22 = smov %s1177_s25 }
 0x394   :  { %25 = sbr.rel (!%p23_p0) target bundleno = 11 (0xb), region = 110 }
 0x399   :  { %522 = vsyncpa [#allocation3], 1 }
 0x39a   :  { %524 = vsyncpa [#allocation3 + $0x1], 1 }
 0x39b   :  { %525 = vsyncpa [#allocation6], 1 }
 0x39c   :  { %527 = vsyncpa [#allocation6 + $0x1], 1 }
 0x39d   :  { %528 = vsyncpa [#allocation9], 1 }
 0x39e   :  { %529 = vsyncpa [#allocation4], 1 }
 0x39f   :  { %531 = vsyncpa [#allocation4 + $0x1], 1 }

</bundles_post_ra>
